<compile_context>
chip_gen: v7x
topology: tpu7x:2x2x1
jax: 0.10.0
libtpu: 0.0.40
codegen_flags: <defaults>
</compile_context>

<pallas_src>
import functools

import jax
import jax.numpy as jnp
from jax.experimental import pallas as pl
from jax.experimental.pallas import tpu as pltpu

_LANE = 128
_MAX_TILE_LANES = 65536          # hard cap on lanes per spatial tile
_VMEM_BUDGET = 24 << 20          # stay under the 32 MiB scoped-VMEM default
_VPU_MAX_CIN = 8                 # rank-1 VPU MACs up to this Cin, MXU beyond


def _pixconv_kernel(x_ref, w_ref, b_ref, o_ref):
    """1x1 conv on one spatial tile.

    x_ref: (1, Cin, tS)  w_ref: (Cout, Cin)  b_ref: (Cout, 1)  o_ref: (1, Cout, tS)
    """
    x = x_ref[0].astype(jnp.float32)        # (Cin, tS), spatial on lanes
    w = w_ref[...].astype(jnp.float32)      # (Cout, Cin)
    b = b_ref[...].astype(jnp.float32)      # (Cout, 1)
    cout, cin = w.shape
    ts = x.shape[-1]

    # Bias broadcast hoisted once per tile (lane broadcast of a (Cout,1) column).
    acc = jnp.broadcast_to(b, (cout, ts))

    if cin <= _VPU_MAX_CIN:
        # Cin rank-1 VPU updates of a lane-dense (Cout, tS) accumulator.
        for ci in range(cin):
            wc = jnp.broadcast_to(w[:, ci:ci + 1], (cout, ts))   # lane broadcast
            xc = jnp.broadcast_to(x[ci:ci + 1, :], (cout, ts))   # sublane broadcast
            acc = acc + wc * xc
    else:
        # Wide-channel fallback: MXU matmul (Cout,Cin) x (Cin,tS).
        acc = acc + jax.lax.dot_general(
            w, x, (((1,), (0,)), ((), ())), preferred_element_type=jnp.float32)

    o_ref[0] = acc.astype(o_ref.dtype)


def _spatial_tiling(hw, cin, cout, n_batch):
    """Pick (grid steps, lanes per tile, padded hw) for the spatial axis."""
    # Largest tile whose double-buffered f32 in+out blocks fit the VMEM budget.
    bytes_per_lane = 4 * (cin + cout) * 2            # f32 in+out, double-buffered
    cap_lanes = min(max(_VMEM_BUDGET // bytes_per_lane, _LANE), _MAX_TILE_LANES)
    cap_slabs = max(cap_lanes // _LANE, 1)

    m = pl.cdiv(hw, _LANE)                           # number of 128-lane slabs
    min_steps = 2 if n_batch == 1 else 1             # keep both v7x TCs busy
    n_s = max(pl.cdiv(m, cap_slabs), min_steps)      # spatial grid steps
    ts = pl.cdiv(m, n_s) * _LANE                     # lanes per tile
    return n_s, ts, n_s * ts


def pix_conv1x1(x_nchw, weight, bias):
    """Lane-dense 1x1 conv.

    x_nchw: (N, Cin, H, W); weight: (Cout, Cin) (PyTorch (Cout,Cin,1,1) squeezed);
    bias: (Cout,).  Returns (N, Cout, H*W) -- same memory order as NCHW conv out.
    """
    N, Cin, H, W = x_nchw.shape
    Cout = weight.shape[0]
    hw = H * W

    n_s, ts, hw_pad = _spatial_tiling(hw, Cin, Cout, N)

    x_r = x_nchw.reshape(N, Cin, hw)                 # pure reshape, no transpose
    if hw_pad != hw:
        x_r = jnp.pad(x_r, ((0, 0), (0, 0), (0, hw_pad - hw)))
    b2 = bias.reshape(Cout, 1)

    out = pl.pallas_call(
        _pixconv_kernel,
        out_shape=jax.ShapeDtypeStruct((N, Cout, hw_pad), x_nchw.dtype),
        grid_spec=pltpu.PrefetchScalarGridSpec(
            num_scalar_prefetch=0,
            grid=(N, n_s),
            in_specs=[
                pl.BlockSpec((1, Cin, ts), lambda n, s: (n, 0, s)),
                pl.BlockSpec((Cout, Cin), lambda n, s: (0, 0)),   # stays resident
                pl.BlockSpec((Cout, 1), lambda n, s: (0, 0)),     # stays resident
            ],
            out_specs=pl.BlockSpec((1, Cout, ts), lambda n, s: (n, 0, s)),
        ),
        compiler_params=pltpu.CompilerParams(
            dimension_semantics=("parallel", "parallel")),
    )(x_r, weight, b2)

    if hw_pad != hw:
        out = out[:, :, :hw]
    return out


class PixBlockPallas:
    """JAX/Pallas re-implementation of PixBlock.forward (NCHW in, NCHW out)."""

    def __init__(self, in_size, out_size=3, scale=2, key=jax.random.PRNGKey(0)):
        self.in_size = in_size
        self.out_size = out_size
        self.scale = scale
        cout = out_size * 2 ** scale
        assert cout % (scale * scale) == 0, "PixelShuffle requires Cout % r^2 == 0"
        kw, kb = jax.random.split(key)
        bound = 1.0 / (in_size ** 0.5)
        # Same orientation as PyTorch Conv2d weight (Cout, Cin, 1, 1) -> (Cout, Cin).
        self.weight = jax.random.uniform(
            kw, (cout, in_size), jnp.float32, minval=-bound, maxval=bound)
        self.bias = jax.random.uniform(
            kb, (cout,), jnp.float32, minval=-bound, maxval=bound)

    @functools.partial(jax.jit, static_argnums=0)
    def __call__(self, x):
        # x: (N, Cin, H, W) -- NCHW like the PyTorch module.
        N, _, H, W = x.shape
        r = self.scale
        cout = self.out_size * 2 ** self.scale
        co = cout // (r * r)
        # 1x1 conv with spatial on lanes: (N, Cin, H, W) -> (N, Cout, H*W).
        y = pix_conv1x1(x, self.weight, self.bias)
        # PixelShuffle(r): (N, Co*r*r, H*W) -> (N, Co, H*r, W*r).
        # Single fused XLA transpose pass (the two reshapes are layout-free).
        y = y.reshape(N, co, r, r, H, W)
        y = jnp.transpose(y, (0, 1, 4, 2, 5, 3))
        return y.reshape(N, co, H * r, W * r)


def _reference_forward(x, weight, bias, out_size, scale):
    """Pure-JAX reference (einsum 1x1 conv + pixel shuffle) for verification."""
    y = jnp.einsum("nchw,dc->ndhw", x, weight) + bias.reshape(1, -1, 1, 1)
    N, C, H, W = y.shape
    r = scale
    co = C // (r * r)
    y = y.reshape(N, co, r, r, H, W)
    y = jnp.transpose(y, (0, 1, 4, 2, 5, 3))
    return y.reshape(N, co, H * r, W * r)


if __name__ == "__main__":
    key = jax.random.PRNGKey(0)
    k_x, k_p = jax.random.split(key)

    N, Cin, H, W = 2, 4, 16, 16
    out_size, scale = 3, 2

    x = jax.random.normal(k_x, (N, Cin, H, W), jnp.float32)

    block = PixBlockPallas(Cin, out_size=out_size, scale=scale, key=k_p)
    out = jax.block_until_ready(block(x))

    # Sanity checks: shape and numerics vs. pure-JAX reference.
    assert out.shape == (N, out_size, H * scale, W * scale), out.shape
    ref = _reference_forward(x, block.weight, block.bias, out_size, scale)
    assert jnp.allclose(out, ref, atol=1e-5, rtol=1e-5), "mismatch vs reference"

    print("KERNEL_OK")
</pallas_src>

<mosaic_0001>
module attributes {stable_mosaic.version = 11 : i64} {
  func.func @_pixconv_kernel(%arg0: i32, %arg1: i32, %arg2: memref<1x4x256xf32, #tpu.memory_space<vmem>>, %arg3: memref<12x4xf32, #tpu.memory_space<vmem>>, %arg4: memref<12x1xf32, #tpu.memory_space<vmem>>, %arg5: memref<1x12x256xf32, #tpu.memory_space<vmem>>) attributes {dimension_semantics = [#tpu.dimension_semantics<parallel>, #tpu.dimension_semantics<parallel>], iteration_bounds = array<i64: 2, 1>, scalar_prefetch = 0 : i64, scratch_operands = 0 : i64, tpu.core_type = #tpu.core_type<tc>, window_params = [{transform_indices = @transform_0, window_bounds = array<i64: 1, 4, 256>}, {pipeline_mode = #tpu.pipeline_mode<synchronous>, transform_indices = @transform_1, window_bounds = array<i64: 12, 4>}, {pipeline_mode = #tpu.pipeline_mode<synchronous>, transform_indices = @transform_2, window_bounds = array<i64: 12, 1>}, {transform_indices = @transform_3, window_bounds = array<i64: 1, 12, 256>}]} {
    %c0 = arith.constant 0 : index
    %c0_0 = arith.constant 0 : index
    %c0_1 = arith.constant 0 : index
    %0 = vector.load %arg2[%c0, %c0_0, %c0_1] : memref<1x4x256xf32, #tpu.memory_space<vmem>>, vector<1x4x256xf32>
    %1 = vector.shape_cast %0 : vector<1x4x256xf32> to vector<4x256xf32>
    %c0_2 = arith.constant 0 : index
    %c0_3 = arith.constant 0 : index
    %2 = vector.load %arg3[%c0_2, %c0_3] : memref<12x4xf32, #tpu.memory_space<vmem>>, vector<12x4xf32>
    %c0_4 = arith.constant 0 : index
    %c0_5 = arith.constant 0 : index
    %3 = vector.load %arg4[%c0_4, %c0_5] : memref<12x1xf32, #tpu.memory_space<vmem>>, vector<12x1xf32>
    %4 = vector.shape_cast %3 : vector<12x1xf32> to vector<12x1xf32>
    %5 = vector.broadcast %4 : vector<12x1xf32> to vector<12x256xf32>
    %6 = vector.extract_strided_slice %2 {offsets = [0, 0], sizes = [12, 1], strides = [1, 1]} : vector<12x4xf32> to vector<12x1xf32>
    %7 = vector.shape_cast %6 : vector<12x1xf32> to vector<12x1xf32>
    %8 = vector.broadcast %7 : vector<12x1xf32> to vector<12x256xf32>
    %9 = vector.extract_strided_slice %1 {offsets = [0, 0], sizes = [1, 256], strides = [1, 1]} : vector<4x256xf32> to vector<1x256xf32>
    %10 = vector.shape_cast %9 : vector<1x256xf32> to vector<1x256xf32>
    %11 = vector.broadcast %10 : vector<1x256xf32> to vector<12x256xf32>
    %12 = arith.mulf %8, %11 : vector<12x256xf32>
    %13 = arith.addf %5, %12 : vector<12x256xf32>
    %14 = vector.extract_strided_slice %2 {offsets = [0, 1], sizes = [12, 1], strides = [1, 1]} : vector<12x4xf32> to vector<12x1xf32>
    %15 = vector.shape_cast %14 : vector<12x1xf32> to vector<12x1xf32>
    %16 = vector.broadcast %15 : vector<12x1xf32> to vector<12x256xf32>
    %17 = vector.extract_strided_slice %1 {offsets = [1, 0], sizes = [1, 256], strides = [1, 1]} : vector<4x256xf32> to vector<1x256xf32>
    %18 = vector.shape_cast %17 : vector<1x256xf32> to vector<1x256xf32>
    %19 = vector.broadcast %18 : vector<1x256xf32> to vector<12x256xf32>
    %20 = arith.mulf %16, %19 : vector<12x256xf32>
    %21 = arith.addf %13, %20 : vector<12x256xf32>
    %22 = vector.extract_strided_slice %2 {offsets = [0, 2], sizes = [12, 1], strides = [1, 1]} : vector<12x4xf32> to vector<12x1xf32>
    %23 = vector.shape_cast %22 : vector<12x1xf32> to vector<12x1xf32>
    %24 = vector.broadcast %23 : vector<12x1xf32> to vector<12x256xf32>
    %25 = vector.extract_strided_slice %1 {offsets = [2, 0], sizes = [1, 256], strides = [1, 1]} : vector<4x256xf32> to vector<1x256xf32>
    %26 = vector.shape_cast %25 : vector<1x256xf32> to vector<1x256xf32>
    %27 = vector.broadcast %26 : vector<1x256xf32> to vector<12x256xf32>
    %28 = arith.mulf %24, %27 : vector<12x256xf32>
    %29 = arith.addf %21, %28 : vector<12x256xf32>
    %30 = vector.extract_strided_slice %2 {offsets = [0, 3], sizes = [12, 1], strides = [1, 1]} : vector<12x4xf32> to vector<12x1xf32>
    %31 = vector.shape_cast %30 : vector<12x1xf32> to vector<12x1xf32>
    %32 = vector.broadcast %31 : vector<12x1xf32> to vector<12x256xf32>
    %33 = vector.extract_strided_slice %1 {offsets = [3, 0], sizes = [1, 256], strides = [1, 1]} : vector<4x256xf32> to vector<1x256xf32>
    %34 = vector.shape_cast %33 : vector<1x256xf32> to vector<1x256xf32>
    %35 = vector.broadcast %34 : vector<1x256xf32> to vector<12x256xf32>
    %36 = arith.mulf %32, %35 : vector<12x256xf32>
    %37 = arith.addf %29, %36 : vector<12x256xf32>
    %c0_6 = arith.constant 0 : index
    %c0_7 = arith.constant 0 : index
    %c0_8 = arith.constant 0 : index
    %38 = vector.load %arg5[%c0_6, %c0_7, %c0_8] : memref<1x12x256xf32, #tpu.memory_space<vmem>>, vector<1x12x256xf32>
    %39 = vector.shape_cast %38 : vector<1x12x256xf32> to vector<12x256xf32>
    %40 = vector.shape_cast %37 : vector<12x256xf32> to vector<1x12x256xf32>
    tpu.vector_store %arg5[%c0_6, %c0_7, %c0_8], %40 {strides = array<i32>} : memref<1x12x256xf32, #tpu.memory_space<vmem>>, vector<1x12x256xf32>,
    return
  }
  func.func @transform_0(%arg0: i32, %arg1: i32) -> (i32, i32, i32) {
    %c0_i32 = arith.constant 0 : i32
    %c0_i32_0 = arith.constant 0 : i32
    return %arg0, %c0_i32, %arg1 : i32, i32, i32
  }
  func.func @transform_1(%arg0: i32, %arg1: i32) -> (i32, i32) {
    %c0_i32 = arith.constant 0 : i32
    %c0_i32_0 = arith.constant 0 : i32
    %c0_i32_1 = arith.constant 0 : i32
    return %c0_i32, %c0_i32_0 : i32, i32
  }
  func.func @transform_2(%arg0: i32, %arg1: i32) -> (i32, i32) {
    %c0_i32 = arith.constant 0 : i32
    %c0_i32_0 = arith.constant 0 : i32
    %c0_i32_1 = arith.constant 0 : i32
    return %c0_i32, %c0_i32_0 : i32, i32
  }
  func.func @transform_3(%arg0: i32, %arg1: i32) -> (i32, i32, i32) {
    %c0_i32 = arith.constant 0 : i32
    %c0_i32_0 = arith.constant 0 : i32
    return %arg0, %c0_i32, %arg1 : i32, i32, i32
  }
}

</mosaic_0001>

<bundles_post_ra>
// kernel: a_call__.1
= control target key start
LH: loop header
LB: loop body
LE: loop exit
PB: predicated region body
PF: predicated region fallthrough
CT: control target
= control target key end

     0   :  { %8 = vsyncpa [#allocation3], 0  ;;  %s816_s0 = inlined_call_operand.vmem [shape: f32[2,4,256], index: 0, kind: input, shape index: {}]   ;;  %s817_s1 = inlined_call_operand.hbm [shape: f32[12,4], index: 1, kind: input, shape index: {}]   ;;  %s818_s2 = inlined_call_operand.hbm [shape: f32[12,1], index: 2, kind: input, shape index: {}]   ;;  %s819_s3 = inlined_call_operand.vmem [shape: f32[2,12,256], index: 3, kind: output, shape index: {}]  }
   0x1   :  { %9 = vsyncpa [#allocation5], 0  ;;  %s699_s12 = smov 0   ;;  %s701_s13 = smov 0  }
   0x2   :  { %s703_s14 = smov 0  }
   0x3 LB: > { %s507_s15 = sadd.s32 4294967295, %s669_s14   ;;  %s27_s16 = sadd.s32 1, %s665_s13  ;;  %s669_s14 = sphi %s703_s14, %s15_s14   ;;  %s665_s13 = sphi %s701_s13, %s829_s13   ;;  %s661_s12 = sphi %s699_s12, %s828_s12  }
   0x4   : > { %p29_p0 = scmp.ge.s32.totalorder %s27_s16, 2  ;;  %p509_p1 = scmp.ge.s32.totalorder %s669_s14, 1 }
   0x5   : > { %p130_p2 = scmp.lt.s32.totalorder %s669_s14, 3  ;;  %p724_p4 = scmp.eq.s32.totalorder %s507_s15, 0 }
   0x6   : > { %s831_s16 = smov (%p29_p0, %s27_s16), 0  ;;  %s671_s19 = smov [#allocation2]  }
   0x7   : > { %p720_p3 = pnand %p509_p1, %p130_p2  ;;  %s142_s20 = sshll.u32 %s671_s19, 4  ;;  %s143_s20 = int_to_ptr.vmem [resolvable:$true] %s142_s20 }
   0x8   : > { %s824_s18 = scalar_select %p724_p4, 1, 0 }
   0x9   : > { %s823_s17 = scalar_select %p720_p3, 1, 0 }
   0xa   : > { %p532_p5 = pneg %p720_p3  ;;  %s672_s22 = smov [#allocation4]  }
   0xb   : > { %s155_s23 = sshll.u32 %s672_s22, 4  ;;  %s583_s26 = scalar_lea.hbm %s817_s1, 256  ;;  %s736_s23 = int_to_ptr.vmem [resolvable:$true] %s155_s23 }
   0xc   : > { %p732_p6 = pnand %p724_p4, %p532_p5  ;;  %p584_p7 = scmp.ne.s32.totalorder %s817_s1, %s583_s26 }
   0xd   : > { %p590_p11 = scmp.lt.u32.totalorder %s583_s26, %s817_s1 }
   0xe   : > { %p585_p8 = pneg %p732_p6 }
  0x10   : > { %p586_p9 = pnand %p585_p8, %p584_p7 }
  0x12   : > { %p587_p10 = pneg %p586_p9 }
  0x14   : > { %p592_p12 = pnand %p590_p11, %p587_p10 }
  0x16   : > { %595 = shalt.err (!%p592_p12)
}
  0x17   : > { %s596_s4 = scalar_lea.vmem %s143_s20, 256  ;;  %p604_p2 = scmp.lt.s32.totalorder %s143_s20, %s143_s20 }
  0x18   : > { %p597_p13 = scmp.ne.s32.totalorder %s143_s20, %s596_s4  ;;  %p605_p5 = scmp.lt.s32.totalorder %s596_s4, %s596_s4 }
  0x1a   : > { %p599_p0 = pnand %p597_p13, %p585_p8  ;;  %p606_p4 = por %p605_p5, %p604_p2 }
  0x1c   : > { %p600_p1 = pneg %p599_p0 }
  0x1e   : > { %p607_p3 = pnand %p606_p4, %p600_p1 }
  0x20   : > { %610 = shalt.err (!%p607_p3)
}
  0x21   : > { %s673_s5 = smov 128   ;;  %s674_s6 = smov 8  }
  0x22   : > { %535 = dma.hbm_to_vmem [thread:$0]  (!%p732_p6), %s817_s1, 256, %s143_s20, [#allocation3], %s673_s5, %s673_s5, %s674_s6  }
  0x23   : > { %s611_s11 = scalar_lea.hbm %s818_s2, 256 }
  0x24   : > { %p612_p7 = scmp.ne.s32.totalorder %s818_s2, %s611_s11  ;;  %p618_p9 = scmp.lt.u32.totalorder %s611_s11, %s818_s2 }
  0x26   : > { %p614_p3 = pnand %p612_p7, %p585_p8 }
  0x28   : > { %p615_p4 = pneg %p614_p3 }
  0x2a   : > { %p620_p10 = pnand %p618_p9, %p615_p4 }
  0x2c   : > { %623 = shalt.err (!%p620_p10)
}
  0x2d   : > { %s624_s20 = scalar_lea.vmem %s736_s23, 256  ;;  %p632_p0 = scmp.lt.s32.totalorder %s736_s23, %s736_s23 }
  0x2e   : > { %p625_p11 = scmp.ne.s32.totalorder %s736_s23, %s624_s20  ;;  %p633_p1 = scmp.lt.s32.totalorder %s624_s20, %s624_s20 }
  0x30   : > { %p627_p12 = pnand %p625_p11, %p585_p8  ;;  %p634_p2 = por %p633_p1, %p632_p0 }
  0x32   : > { %p628_p13 = pneg %p627_p12 }
  0x34   : > { %p635_p5 = pnand %p634_p2, %p628_p13 }
  0x36   : > { %638 = shalt.err (!%p635_p5)
}
  0x37   : > { %538 = dma.hbm_to_vmem [thread:$0]  (!%p732_p6), %s818_s2, 256, %s736_s23, [#allocation5], %s673_s5, %s673_s5, %s674_s6  }
  0x38   : > { %p826_p7 = scmp.ne.s32.totalorder %s823_s17, 0 }
  0x39   : > { %p827_p3 = scmp.ne.s32.totalorder (!%p826_p7), %s824_s18, 0 }
  0x3a   : > { %184 = sbr.rel (%p826_p7) target bundleno = 226 (0xe2), region = 32 }
  0x41   : > { %652 = dma.done.wait (%p827_p3), [#allocation3], 256  }
  0x42   : > { %654 = vsyncadd (%p827_p3), [#allocation3], 4294967040 }
  0x43   : > { %656 = dma.done.wait (%p827_p3), [#allocation5], 256  }
  0x44   : > { %658 = vsyncadd (%p827_p3), [#allocation5], 4294967040  ;;  %v675_v0 = vmov 0   ;;  %v243_v1 = vld [vmem:[#allocation4] sm:$0xff]  ;;  %v241_v2 = vld [vmem:[#allocation2] sm:$0xff]  ;;  %v676_v5 = vmov 1   ;;  %v266_v8 = vlaneseq }
  0x45   : > { %576 = vset.pattern.permute.xlu1 %v675_v0  ;;  %575 = vset.pattern.permute.xlu0 %v675_v0  ;;  %v244_v3 = vld [vmem:[#allocation4 + $0x8] sm:$0xf]  ;;  %v242_v4 = vld [vmem:[#allocation2 + $0x8] sm:$0xf]  ;;  %v677_v6 = vmov 2   ;;  %v678_v7 = vmov 3  }
  0x46   : > { %247 = vperm.xlu1 %576, %v243_v1   ;;  %257 = vperm.xlu0 %575, %v241_v2   ;;  %p221_p6 = scmp.lt.s32.totalorder %s661_s12, 1  ;;  %v267_v9 = vshrl.u32 %v266_v8, 7 }
  0x48   : > { %s833_s12 = smov (!%p221_p6, %s661_s12), 1  ;;  %v268_v11 = vsub.s32 0, %v267_v9  ;;  %v272_v12 = vsub.s32 4, %v267_v9  ;;  %v302_v15 = vsub.s32 1, %v267_v9  ;;  %v306_v16 = vsub.s32 5, %v267_v9 }
  0x49   : > { %s522_s17 = sshll.u32 %s833_s12, 3  ;;  %v336_v21 = vsub.s32 2, %v267_v9  ;;  %v340_v22 = vsub.s32 6, %v267_v9  ;;  %v370_v25 = vsub.s32 3, %v267_v9  ;;  %v374_v26 = vsub.s32 7, %v267_v9  ;;  %s523_s27 = sshll.u32 %s833_s12, 5 }
  0x4a   : > { %252 = vperm.xlu1 %576, %v244_v3   ;;  %262 = vperm.xlu0 %575, %v242_v4   ;;  %s228_s23 = scalar_lea.vmem %s816_s0, %s522_s17  ;;  %s238_s30 = scalar_lea.vmem %s819_s3, %s523_s27 }
  0x4b   : > { %v240_v14 = vld [vmem:[%s228_s23] sm:$0xff] }
  0x4c   : > { %v269_v17 = vrot.slane %v240_v14, %v268_v11  ;;  %v273_v18 = vrot.slane %v240_v14, %v272_v12  ;;  %v303_v23 = vrot.slane %v240_v14, %v302_v15  ;;  %v307_v24 = vrot.slane %v240_v14, %v306_v16 }
  0x4d   : > { %v337_v29 = vrot.slane %v240_v14, %v336_v21  ;;  %v341_v30 = vrot.slane %v240_v14, %v340_v22  ;;  %v371_v35 = vrot.slane %v240_v14, %v370_v25  ;;  %v375_v36 = vrot.slane %v240_v14, %v374_v26 }
  0x4e   : > { %578 = vset.pattern.permute.xlu1 %v676_v5  ;;  %577 = vset.pattern.permute.xlu0 %v676_v5  ;;  %v279_v27 = vrot.slane %v269_v17, %v268_v11  ;;  %v283_v28 = vrot.slane %v273_v18, %v268_v11  ;;  %v313_v32 = vrot.slane %v303_v23, %v302_v15 }
  0x4f   : > { %297 = vperm.xlu1 %578, %v242_v4   ;;  %293 = vperm.xlu0 %577, %v241_v2   ;;  %v317_v33 = vrot.slane %v307_v24, %v302_v15  ;;  %v347_v39 = vrot.slane %v337_v29, %v336_v21  ;;  %v351_v40 = vrot.slane %v341_v30, %v336_v21 }
  0x50   : > { %v381_v46 = vrot.slane %v371_v35, %v370_v25  ;;  %v385_v47 = vrot.slane %v375_v36, %v370_v25 }
  0x53   : > { %579 = vset.pattern.permute.xlu1 %v677_v6  ;;  %580 = vset.pattern.permute.xlu0 %v677_v6 }
  0x54   : > { %327 = vperm.xlu1 %579, %v241_v2   ;;  %331 = vperm.xlu0 %580, %v242_v4  }
  0x58   : > { %581 = vset.pattern.permute.xlu1 %v678_v7  ;;  %582 = vset.pattern.permute.xlu0 %v678_v7 }
  0x59   : > { %361 = vperm.xlu1 %581, %v241_v2  }
  0x5d   : > { %365 = vperm.xlu1 %581, %v242_v4  }
  0xc5   : > { %v248_v10 = vpop.permute.xlu1 %247  ;;  %v258_v13 = vpop.permute.xlu0 %257 }
  0xc6   : > { %v284_v37 = vmul.f32 %v279_v27, %v258_v13  ;;  %v285_v38 = vmul.f32 %v283_v28, %v258_v13 }
  0xc8   : > { %v288_v48 = vadd.f32 %v284_v37, %v248_v10  ;;  %v289_v49 = vadd.f32 %v285_v38, %v248_v10 }
  0xc9   : > { %v253_v19 = vpop.permute.xlu1 %252  ;;  %v263_v20 = vpop.permute.xlu0 %262 }
  0xca   : > { %v286_v44 = vmul.f32 %v279_v27, %v263_v20  ;;  %v287_v45 = vmul.f32 %v283_v28, %v263_v20 }
  0xcc   : > { %v290_v57 = vadd.f32 %v286_v44, %v253_v19  ;;  %v291_v58 = vadd.f32 %v287_v45, %v253_v19 }
  0xce   : > { %v298_v31 = vpop.permute.xlu1 %297  ;;  %v294_v34 = vpop.permute.xlu0 %293 }
  0xcf   : > { %v318_v41 = vmul.f32 %v313_v32, %v294_v34  ;;  %v319_v42 = vmul.f32 %v317_v33, %v294_v34  ;;  %v320_v53 = vmul.f32 %v313_v32, %v298_v31  ;;  %v321_v54 = vmul.f32 %v317_v33, %v298_v31 }
  0xd1   : > { %v322_v55 = vadd.f32 %v318_v41, %v288_v48  ;;  %v323_v56 = vadd.f32 %v319_v42, %v289_v49  ;;  %v324_v2 = vadd.f32 %v320_v53, %v290_v57  ;;  %v325_v3 = vadd.f32 %v321_v54, %v291_v58 }
  0xd3   : > { %v328_v43 = vpop.permute.xlu1 %327  ;;  %v332_v52 = vpop.permute.xlu0 %331 }
  0xd4   : > { %v352_v50 = vmul.f32 %v347_v39, %v328_v43  ;;  %v353_v51 = vmul.f32 %v351_v40, %v328_v43  ;;  %v354_v59 = vmul.f32 %v347_v39, %v332_v52  ;;  %v355_v60 = vmul.f32 %v351_v40, %v332_v52 }
  0xd6   : > { %v356_v62 = vadd.f32 %v352_v50, %v322_v55  ;;  %v357_v63 = vadd.f32 %v353_v51, %v323_v56  ;;  %v358_v7 = vadd.f32 %v354_v59, %v324_v2  ;;  %v359_v8 = vadd.f32 %v355_v60, %v325_v3 }
  0xd8   : > { %v362_v61 = vpop.permute.xlu1 %361 }
  0xd9   : > { %v386_v0 = vmul.f32 %v381_v46, %v362_v61  ;;  %v387_v1 = vmul.f32 %v385_v47, %v362_v61 }
  0xdb   : > { %v390_v4 = vadd.f32 %v386_v0, %v356_v62  ;;  %v391_v5 = vadd.f32 %v387_v1, %v357_v63 }
  0xdc   : > { %v366_v6 = vpop.permute.xlu1 %365 }
  0xdd   : > { %394 = vst [vmem:[%s238_s30] sm:$0xff] %v390_v4  ;;  %395 = vst [vmem:[%s238_s30 + $0x8] sm:$0xff] %v391_v5  ;;  %v388_v9 = vmul.f32 %v381_v46, %v366_v6  ;;  %v389_v10 = vmul.f32 %v385_v47, %v366_v6 }
  0xdf   : > { %v392_v11 = vadd.f32 %v388_v9, %v358_v7  ;;  %v393_v12 = vadd.f32 %v389_v10, %v359_v8 }
  0xe1   : > { %396 = vst [vmem:[%s238_s30 + $0x10] sm:$0xf] %v392_v11  ;;  %397 = vst [vmem:[%s238_s30 + $0x18] sm:$0xf] %v393_v12 }
  0xe2 PF: > { %s15_s14 = sadd.s32 1, %s669_s14   ;;  %s828_s12 = smov %s665_s13 }
  0xe3   : > { %p12_p8 = scmp.ge.s32.totalorder %s15_s14, 4   ;;  %s829_s13 = smov %s831_s16 }
  0xe5   :  { %14 = sbr.rel (!%p12_p8) target bundleno = 3 (0x3), region = 71 }
  0xec   :  { %428 = vsyncpa [#allocation3], 1 }
  0xed   :  { %430 = vsyncpa [#allocation3 + $0x1], 1 }
  0xee   :  { %431 = vsyncpa [#allocation5], 1 }

</bundles_post_ra>
